<compile_context>
chip_gen: v7x
topology: tpu7x:2x2x1
jax: 0.10.0
libtpu: 0.0.40
codegen_flags: <defaults>
</compile_context>

<pallas_src>
import jax
import jax.numpy as jnp
from jax.experimental import pallas as pl
from jax.experimental.pallas import tpu as pltpu


def _round_up(a, m):
    return (a + m - 1) // m * m


def dqn_kernel(x_ref, w1_ref, b1_ref, w2_ref, b2_ref, o_ref):
    # Feature-major layout: x_ref is (in_p, TB); weights are PyTorch-style
    # (out_features, in_features).  Lane axis = batch throughout.
    h = jnp.dot(w1_ref[...], x_ref[...], preferred_element_type=jnp.float32)   # (hid_p, TB)
    h = jnp.maximum(h + b1_ref[...], 0.0)                                       # bias + ReLU (VPU)
    q = jnp.dot(w2_ref[...], h, preferred_element_type=jnp.float32)             # (out, TB)
    o_ref[...] = q + b2_ref[...]                                                # lane-dense store


def dqn_forward(x, w1, b1, w2, b2):
    """y = relu(x @ w1 + b1) @ w2 + b2.

    x: (B, in), w1: (in, hid), b1: (1, hid) or (hid,), w2: (hid, out),
    b2: (1, out) or (out,).  Returns (B, out) float32.
    """
    B, in_nodes = x.shape
    hid = w1.shape[1]
    out = w2.shape[1]

    # Pad features to clean (sublane, lane) tiles; tile the batch.
    in_p = _round_up(in_nodes, 8)
    hid_p = _round_up(hid, 128)
    if B <= 128:
        TB = _round_up(max(B, 1), 8)      # single tile, full-array block
    else:
        TB = 256                           # lane-aligned batch tiles
    B_p = _round_up(B, TB)
    nb = B_p // TB

    f32 = jnp.float32
    # Zero padding keeps the math exact: padded hidden units get bias 0 ->
    # relu(0)=0 -> contribute 0 through zero rows of w2; padded input rows
    # multiply zero columns of w1; padded batch columns are sliced off below.
    x_t = jnp.zeros((in_p, B_p), f32).at[:in_nodes, :B].set(x.T.astype(f32))
    w1_t = jnp.zeros((hid_p, in_p), f32).at[:hid, :in_nodes].set(w1.T.astype(f32))
    b1_t = jnp.zeros((hid_p, 1), f32).at[:hid, 0].set(b1.reshape(-1).astype(f32))
    w2_t = jnp.zeros((out, hid_p), f32).at[:, :hid].set(w2.T.astype(f32))
    b2_t = b2.reshape(out, 1).astype(f32)

    cost = pl.CostEstimate(
        flops=2 * B_p * (in_p * hid_p + hid_p * out),
        transcendentals=0,
        bytes_accessed=4 * (x_t.size + w1_t.size + b1_t.size
                            + w2_t.size + b2_t.size + out * B_p),
    )

    q_t = pl.pallas_call(
        dqn_kernel,
        out_shape=jax.ShapeDtypeStruct((out, B_p), f32),
        grid=(nb,),
        in_specs=[
            pl.BlockSpec((in_p, TB), lambda i: (0, i)),      # x tile: per batch tile
            pl.BlockSpec((hid_p, in_p), lambda i: (0, 0)),   # weights: VMEM-resident
            pl.BlockSpec((hid_p, 1), lambda i: (0, 0)),
            pl.BlockSpec((out, hid_p), lambda i: (0, 0)),
            pl.BlockSpec((out, 1), lambda i: (0, 0)),
        ],
        out_specs=pl.BlockSpec((out, TB), lambda i: (0, i)),  # lane axis = batch
        compiler_params=pltpu.CompilerParams(dimension_semantics=("parallel",)),
        cost_estimate=cost,
    )(x_t, w1_t, b1_t, w2_t, b2_t)

    # Back to the PyTorch (B, out) layout; drop batch padding.
    return q_t.T[:B]


def init_params(key, input_nodes, hidden_nodes, output_nodes):
    # Deterministic synthetic init (PyTorch-style uniform bounds), not a checkpoint load.
    k1, k2, k3, k4 = jax.random.split(key, 4)
    bound1 = 1.0 / (input_nodes ** 0.5)
    bound2 = 1.0 / (hidden_nodes ** 0.5)
    w1 = jax.random.uniform(k1, (input_nodes, hidden_nodes), jnp.float32, -bound1, bound1)
    b1 = jax.random.uniform(k2, (1, hidden_nodes), jnp.float32, -bound1, bound1)
    w2 = jax.random.uniform(k3, (hidden_nodes, output_nodes), jnp.float32, -bound2, bound2)
    b2 = jax.random.uniform(k4, (1, output_nodes), jnp.float32, -bound2, bound2)
    return w1, b1, w2, b2


if __name__ == "__main__":
    # CartPole: observation dim = 4, actions = 2
    input_nodes, hidden_nodes, output_nodes = 4, 32, 2

    key = jax.random.PRNGKey(0)
    kx, kp, kx2 = jax.random.split(key, 3)
    w1, b1, w2, b2 = init_params(kp, input_nodes, hidden_nodes, output_nodes)

    # Small per-step-style batch (single tile path).
    x_small = jax.random.normal(kx, (8, input_nodes), jnp.float32)
    out_small = jax.block_until_ready(dqn_forward(x_small, w1, b1, w2, b2))
    ref_small = jnp.maximum(x_small @ w1 + b1, 0.0) @ w2 + b2
    assert out_small.shape == (8, output_nodes)
    assert jnp.allclose(out_small, ref_small, atol=1e-5, rtol=1e-5)

    # Replay-minibatch-style batch exercising the tiled (multi-block, padded) path.
    x_big = jax.random.normal(kx2, (300, input_nodes), jnp.float32)
    out_big = jax.block_until_ready(dqn_forward(x_big, w1, b1, w2, b2))
    ref_big = jnp.maximum(x_big @ w1 + b1, 0.0) @ w2 + b2
    assert out_big.shape == (300, output_nodes)
    assert jnp.allclose(out_big, ref_big, atol=1e-5, rtol=1e-5)

    print("KERNEL_OK")
</pallas_src>

<mosaic_0001>
module attributes {stable_mosaic.version = 11 : i64} {
  func.func @dqn_kernel(%arg0: i32, %arg1: memref<8x8xf32, #tpu.memory_space<vmem>>, %arg2: memref<128x8xf32, #tpu.memory_space<vmem>>, %arg3: memref<128x1xf32, #tpu.memory_space<vmem>>, %arg4: memref<2x128xf32, #tpu.memory_space<vmem>>, %arg5: memref<2x1xf32, #tpu.memory_space<vmem>>, %arg6: memref<2x8xf32, #tpu.memory_space<vmem>>) attributes {dimension_semantics = [#tpu.dimension_semantics<parallel>], iteration_bounds = array<i64: 1>, scalar_prefetch = 0 : i64, scratch_operands = 0 : i64, tpu.core_type = #tpu.core_type<tc>, window_params = [{transform_indices = @transform_0, window_bounds = array<i64: 8, 8>}, {pipeline_mode = #tpu.pipeline_mode<synchronous>, transform_indices = @transform_1, window_bounds = array<i64: 128, 8>}, {pipeline_mode = #tpu.pipeline_mode<synchronous>, transform_indices = @transform_2, window_bounds = array<i64: 128, 1>}, {pipeline_mode = #tpu.pipeline_mode<synchronous>, transform_indices = @transform_3, window_bounds = array<i64: 2, 128>}, {pipeline_mode = #tpu.pipeline_mode<synchronous>, transform_indices = @transform_4, window_bounds = array<i64: 2, 1>}, {transform_indices = @transform_5, window_bounds = array<i64: 2, 8>}]} {
    %c0 = arith.constant 0 : index
    %c0_0 = arith.constant 0 : index
    %0 = vector.load %arg2[%c0, %c0_0] : memref<128x8xf32, #tpu.memory_space<vmem>>, vector<128x8xf32>
    %c0_1 = arith.constant 0 : index
    %c0_2 = arith.constant 0 : index
    %1 = vector.load %arg1[%c0_1, %c0_2] : memref<8x8xf32, #tpu.memory_space<vmem>>, vector<8x8xf32>
    %cst = arith.constant dense<0.000000e+00> : vector<128x8xf32>
    %2 = tpu.matmul %0, %1, %cst {dimension_numbers = #tpu.dot_dimension_numbers<[1], [0], [0], [1], [0, 0, 1, 1], [], []>} : vector<128x8xf32>, vector<8x8xf32>, vector<128x8xf32> -> vector<128x8xf32>
    %c0_3 = arith.constant 0 : index
    %c0_4 = arith.constant 0 : index
    %3 = vector.load %arg3[%c0_3, %c0_4] : memref<128x1xf32, #tpu.memory_space<vmem>>, vector<128x1xf32>
    %4 = vector.broadcast %3 : vector<128x1xf32> to vector<128x8xf32>
    %5 = arith.addf %2, %4 : vector<128x8xf32>
    %cst_5 = arith.constant 0.000000e+00 : f32
    %6 = vector.broadcast %cst_5 : f32 to vector<128x8xf32>
    %7 = arith.maximumf %5, %6 : vector<128x8xf32>
    %c0_6 = arith.constant 0 : index
    %c0_7 = arith.constant 0 : index
    %8 = vector.load %arg4[%c0_6, %c0_7] : memref<2x128xf32, #tpu.memory_space<vmem>>, vector<2x128xf32>
    %cst_8 = arith.constant dense<0.000000e+00> : vector<2x8xf32>
    %9 = tpu.matmul %8, %7, %cst_8 {dimension_numbers = #tpu.dot_dimension_numbers<[1], [0], [0], [1], [0, 0, 1, 1], [], []>} : vector<2x128xf32>, vector<128x8xf32>, vector<2x8xf32> -> vector<2x8xf32>
    %c0_9 = arith.constant 0 : index
    %c0_10 = arith.constant 0 : index
    %10 = vector.load %arg5[%c0_9, %c0_10] : memref<2x1xf32, #tpu.memory_space<vmem>>, vector<2x1xf32>
    %11 = vector.broadcast %10 : vector<2x1xf32> to vector<2x8xf32>
    %12 = arith.addf %9, %11 : vector<2x8xf32>
    %c0_11 = arith.constant 0 : index
    %c0_12 = arith.constant 0 : index
    %13 = vector.load %arg6[%c0_11, %c0_12] : memref<2x8xf32, #tpu.memory_space<vmem>>, vector<2x8xf32>
    tpu.vector_store %arg6[%c0_11, %c0_12], %12 {strides = array<i32>} : memref<2x8xf32, #tpu.memory_space<vmem>>, vector<2x8xf32>,
    return
  }
  func.func @transform_0(%arg0: i32) -> (i32, i32) {
    %c0_i32 = arith.constant 0 : i32
    %c0_i32_0 = arith.constant 0 : i32
    return %c0_i32, %arg0 : i32, i32
  }
  func.func @transform_1(%arg0: i32) -> (i32, i32) {
    %c0_i32 = arith.constant 0 : i32
    %c0_i32_0 = arith.constant 0 : i32
    %c0_i32_1 = arith.constant 0 : i32
    return %c0_i32, %c0_i32_0 : i32, i32
  }
  func.func @transform_2(%arg0: i32) -> (i32, i32) {
    %c0_i32 = arith.constant 0 : i32
    %c0_i32_0 = arith.constant 0 : i32
    %c0_i32_1 = arith.constant 0 : i32
    return %c0_i32, %c0_i32_0 : i32, i32
  }
  func.func @transform_3(%arg0: i32) -> (i32, i32) {
    %c0_i32 = arith.constant 0 : i32
    %c0_i32_0 = arith.constant 0 : i32
    %c0_i32_1 = arith.constant 0 : i32
    return %c0_i32, %c0_i32_0 : i32, i32
  }
  func.func @transform_4(%arg0: i32) -> (i32, i32) {
    %c0_i32 = arith.constant 0 : i32
    %c0_i32_0 = arith.constant 0 : i32
    %c0_i32_1 = arith.constant 0 : i32
    return %c0_i32, %c0_i32_0 : i32, i32
  }
  func.func @transform_5(%arg0: i32) -> (i32, i32) {
    %c0_i32 = arith.constant 0 : i32
    %c0_i32_0 = arith.constant 0 : i32
    return %c0_i32, %arg0 : i32, i32
  }
}

</mosaic_0001>

<bundles_post_ra>
// kernel: tpu_custom_call.1
= control target key start
LH: loop header
LB: loop body
LE: loop exit
PB: predicated region body
PF: predicated region fallthrough
CT: control target
= control target key end

     0   :  { %vm134_vm0 = vcmask 64512   ;;  %v603_v4 = vmov 0   ;;  %s779_s0 = inlined_call_operand.vmem [shape: f32[8,8], index: 0, kind: input, shape index: {}]   ;;  %s780_s1 = inlined_call_operand.vmem [shape: f32[128,8], index: 1, kind: input, shape index: {}]   ;;  %s781_s2 = inlined_call_operand.vmem [shape: f32[128,1], index: 2, kind: input, shape index: {}]   ;;  %s782_s3 = inlined_call_operand.vmem [shape: f32[2,128], index: 3, kind: input, shape index: {}]   ;;  %s783_s4 = inlined_call_operand.vmem [shape: f32[2,1], index: 4, kind: input, shape index: {}]   ;;  %s784_s5 = inlined_call_operand.hbm [shape: f32[2,8], index: 5, kind: output, shape index: {}]  }
   0x1   :  { %v37_v0 = vld [vmem:[%s779_s0] sm:$0xff]  ;;  %v22_v2 = vld [vmem:[%s780_s1 + $0x8] sm:$0xff]  ;;  %v23_v3 = vld [vmem:[%s780_s1 + $0x10] sm:$0xff]  ;;  %577 = vset.pattern.permute.xlu0 %v603_v4  ;;  %578 = vset.pattern.permute.xlu1 %v603_v4 }
   0x2   :  { %v21_v1 = vld [vmem:[%s780_s1] sm:$0xff]  ;;  %487 = vmatprep.subr.mxu0 %v37_v0  ;;  %v24_v5 = vld [vmem:[%s780_s1 + $0x18] sm:$0xff]  ;;  %v40_v8 = vld [vmem:[%s781_s2 + $0x10] sm:$0xff] }
   0x3   :  { %489 = vmatprep.mubr.msk.f32.mxu0 %vm134_vm0, %v21_v1  ;;  %488 = vmatpush3.msra.mxu0 %v37_v0  ;;  %v25_v6 = vld [vmem:[%s780_s1 + $0x20] sm:$0xff]  ;;  %v39_v9 = vld [vmem:[%s781_s2 + $0x8] sm:$0xff]  ;;  %v41_v11 = vld [vmem:[%s781_s2 + $0x18] sm:$0xff] }
   0x4   :  { %490 = vmatmul.mubr.msk.f32.vlgmr.msra.gmra.mrb[0].mxu0 %vm134_vm0, %v22_v2  ;;  %v38_v7 = vld [vmem:[%s781_s2] sm:$0xff]  ;;  %66 = vperm.xlu1 %578, %v40_v8   ;;  %v26_v10 = vld [vmem:[%s780_s1 + $0x28] sm:$0xff]  ;;  %v27_v12 = vld [vmem:[%s780_s1 + $0x30] sm:$0xff] }
   0x5   :  { %492 = vmatprep.mubr.msk.f32.mxu0 %vm134_vm0, %v23_v3  ;;  %56 = vperm.xlu0 %577, %v38_v7   ;;  %v42_v13 = vld [vmem:[%s781_s2 + $0x20] sm:$0xff] }
   0x8   :  { %493 = vmatmul.mubr.msk.f32.gmra.mrb[2].mxu0 %vm134_vm0, %v24_v5  ;;  %71 = vperm.xlu1 %578, %v41_v11  }
   0x9   :  { %495 = vmatprep.mubr.msk.f32.mxu0 %vm134_vm0, %v25_v6  ;;  %61 = vperm.xlu0 %577, %v39_v9  }
   0xc   :  { %496 = vmatmul.mubr.msk.f32.gmra.mrb[4].mxu0 %vm134_vm0, %v26_v10 }
   0xd   :  { %10 = vsyncpa [#allocation3], 0  ;;  %498 = vmatprep.mubr.msk.f32.mxu0 %vm134_vm0, %v27_v12  ;;  %v28_v14 = vld [vmem:[%s780_s1 + $0x38] sm:$0xff]  ;;  %v43_v15 = vld [vmem:[%s781_s2 + $0x28] sm:$0xff]  ;;  %76 = vperm.xlu0 %577, %v42_v13   ;;  %v604_v35 = vmov 0.0|0.0   ;;  %vm605_vm1 = vmmov 0  }
   0xe   :  { %v29_v16 = vld [vmem:[%s780_s1 + $0x40] sm:$0xff]  ;;  %v44_v17 = vld [vmem:[%s781_s2 + $0x30] sm:$0xff]  ;;  %81 = vperm.xlu1 %578, %v43_v15   ;;  %v30_v18 = vld [vmem:[%s780_s1 + $0x48] sm:$0xff]  ;;  %548 = vmatprep.subr.bf16.mxu1 %v604_v35  ;;  %v606_v36 = vmov 0.0   ;;  %vm421_vm2 = vcmask 58368  }
   0xf   :  { %v45_v19 = vld [vmem:[%s781_s2 + $0x38] sm:$0xff]  ;;  %v31_v20 = vld [vmem:[%s780_s1 + $0x50] sm:$0xff]  ;;  %v46_v21 = vld [vmem:[%s781_s2 + $0x40] sm:$0xff]  ;;  %545 = vmatprep.mubr.msk.f32.mxu1 %vm605_vm1, %v606_v36 }
  0x10   :  { %499 = vmatmul.mubr.msk.f32.gmra.mrb[6].mxu0 %vm134_vm0, %v28_v14  ;;  %v32_v22 = vld [vmem:[%s780_s1 + $0x58] sm:$0xff]  ;;  %v47_v23 = vld [vmem:[%s781_s2 + $0x48] sm:$0xff]  ;;  %v33_v24 = vld [vmem:[%s780_s1 + $0x60] sm:$0xff] }
  0x11   :  { %501 = vmatprep.mubr.msk.f32.mxu0 %vm134_vm0, %v29_v16  ;;  %86 = vperm.xlu0 %577, %v44_v17   ;;  %v48_v25 = vld [vmem:[%s781_s2 + $0x50] sm:$0xff]  ;;  %v34_v26 = vld [vmem:[%s780_s1 + $0x68] sm:$0xff]  ;;  %v49_v27 = vld [vmem:[%s781_s2 + $0x58] sm:$0xff] }
  0x12   :  { %91 = vperm.xlu1 %578, %v45_v19   ;;  %v35_v28 = vld [vmem:[%s780_s1 + $0x70] sm:$0xff]  ;;  %v50_v29 = vld [vmem:[%s781_s2 + $0x60] sm:$0xff]  ;;  %v36_v30 = vld [vmem:[%s780_s1 + $0x78] sm:$0xff] }
  0x13   :  { %v51_v31 = vld [vmem:[%s781_s2 + $0x68] sm:$0xff]  ;;  %v52_v32 = vld [vmem:[%s781_s2 + $0x70] sm:$0xff]  ;;  %v53_v33 = vld [vmem:[%s781_s2 + $0x78] sm:$0xff] }
  0x14   :  { %502 = vmatmul.mubr.msk.f32.gmra.mrb[8].mxu0 %vm134_vm0, %v30_v18  ;;  %v345_v34 = vld [vmem:[%s783_s4] sm:$0x3]  ;;  %s607_s4 = smov [#allocation2]  }
  0x15   :  { %504 = vmatprep.mubr.msk.f32.mxu0 %vm134_vm0, %v31_v20  ;;  %96 = vperm.xlu0 %577, %v46_v21   ;;  %s429_s8 = sshll.u32 %s607_s4, 4  ;;  %s430_s8 = int_to_ptr.vmem [resolvable:$true] %s429_s8 }
  0x16   :  { %101 = vperm.xlu1 %578, %v47_v23   ;;  %s579_s9 = scalar_lea.vmem %s430_s8, 32  ;;  %p584_p1 = scmp.lt.s32.totalorder %s430_s8, %s430_s8 }
  0x17   :  { %p580_p0 = scmp.ne.s32.totalorder %s430_s8, %s579_s9  ;;  %p585_p2 = scmp.lt.s32.totalorder %s579_s9, %s579_s9 }
  0x18   :  { %505 = vmatmul.mubr.msk.f32.gmra.mrb[10].mxu0 %vm134_vm0, %v32_v22 }
  0x19   :  { %507 = vmatprep.mubr.msk.f32.mxu0 %vm134_vm0, %v33_v24  ;;  %106 = vperm.xlu0 %577, %v48_v25   ;;  %p586_p3 = por %p585_p2, %p584_p1 }
  0x1a   :  { %111 = vperm.xlu1 %578, %v49_v27  }
  0x1b   :  { %p587_p4 = pnand %p586_p3, %p580_p0 }
  0x1c   :  { %508 = vmatmul.mubr.msk.f32.gmra.mrb[12].mxu0 %vm134_vm0, %v34_v26 }
  0x1d   :  { %510 = vmatprep.mubr.msk.f32.mxu0 %vm134_vm0, %v35_v28  ;;  %116 = vperm.xlu0 %577, %v50_v29  }
  0x1e   :  { %121 = vperm.xlu1 %578, %v51_v31  }
  0x20   :  { %511 = vmatmul.mubr.msk.f32.gmra.mrb[14].mxu0 %vm134_vm0, %v36_v30 }
  0x21   :  { %126 = vperm.xlu0 %577, %v52_v32  }
  0x22   :  { %131 = vperm.xlu1 %578, %v53_v33  }
  0x25   :  { %348 = vperm.xlu0 %577, %v345_v34  }
  0x83   :  { %v67_v37 = vpop.permute.xlu1 %66 }
  0x84   :  { %v57_v38 = vpop.permute.xlu0 %56 }
  0x87   :  { %v72_v39 = vpop.permute.xlu1 %71 }
  0x88   :  { %v62_v40 = vpop.permute.xlu0 %61 }
  0x8c   :  { %v77_v42 = vpop.permute.xlu0 %76 }
  0x8d   :  { %v82_v41 = vpop.permute.xlu1 %81 }
  0x90   :  { %v87_v51 = vpop.permute.xlu0 %86 }
  0x91   :  { %v92_v48 = vpop.permute.xlu1 %91 }
  0x94   :  { %v97_v0 = vpop.permute.xlu0 %96 }
  0x95   :  { %v102_v61 = vpop.permute.xlu1 %101 }
  0x98   :  { %v107_v12 = vpop.permute.xlu0 %106 }
  0x99   :  { %v112_v9 = vpop.permute.xlu1 %111 }
  0x9c   :  { %v117_v25 = vpop.permute.xlu0 %116 }
  0x9d   :  { %v122_v22 = vpop.permute.xlu1 %121 }
  0xa1   :  { %v132_v34 = vpop.permute.xlu1 %131 }
  0xd7   :  { %v491_v43 = vpop.f32.mrb[0].mxu0 }
  0xd8   :  { %v255_v44 = vadd.f32 %v491_v43, %v62_v40  ;;  %v249_v45 = vpop.f32.mrb[1].mxu0 }
  0xd9   :  { %v250_v46 = vadd.f32 %v249_v45, %v57_v38  ;;  %v127_v38 = vpop.permute.xlu0 %126 }
  0xda   :  { %v329_v47 = vmax.f32 %v255_v44, 0.0 }
  0xdb   :  { %v328_v49 = vmax.f32 %v250_v46, 0.0  ;;  %v494_v50 = vpop.f32.mrb[2].mxu0  ;;  %v344_v46 = vld [vmem:[%s782_s3] sm:$0x3] }
  0xdc   :  { %v265_v52 = vadd.f32 %v494_v50, %v72_v39  ;;  %v259_v53 = vpop.f32.mrb[3].mxu0 }
  0xdd   :  { %v260_v54 = vadd.f32 %v259_v53, %v67_v37  ;;  %v549_v55 = vpack.c.bf16 %v329_v47, %v328_v49  ;;  %v349_v47 = vpop.permute.xlu0 %348 }
  0xde   :  { %v331_v56 = vmax.f32 %v265_v52, 0.0 }
  0xdf   :  { %v330_v57 = vmax.f32 %v260_v54, 0.0  ;;  %v497_v58 = vpop.f32.mrb[4].mxu0  ;;  %550 = vmatpush3.bf16.msra.mxu1 %v549_v55 }
  0xe0   :  { %v275_v59 = vadd.f32 %v497_v58, %v82_v41  ;;  %v269_v60 = vpop.f32.mrb[5].mxu0  ;;  %551 = vmatprep.subr.bf16.mxu1 %v604_v35 }
  0xe1   :  { %v552_v62 = vpack.c.bf16 %v331_v56, %v330_v57  ;;  %v270_v63 = vadd.f32 %v269_v60, %v77_v42 }
  0xe2   :  { %v333_v1 = vmax.f32 %v275_v59, 0.0 }
  0xe3   :  { %v332_v2 = vmax.f32 %v270_v63, 0.0  ;;  %v500_v3 = vpop.f32.mrb[6].mxu0  ;;  %553 = vmatpush3.bf16.msra.mxu1 %v552_v62 }
  0xe4   :  { %v285_v4 = vadd.f32 %v500_v3, %v92_v48  ;;  %v279_v5 = vpop.f32.mrb[7].mxu0  ;;  %554 = vmatprep.subr.bf16.mxu1 %v604_v35 }
  0xe5   :  { %v555_v6 = vpack.c.bf16 %v333_v1, %v332_v2  ;;  %v280_v7 = vadd.f32 %v279_v5, %v87_v51 }
  0xe6   :  { %v335_v8 = vmax.f32 %v285_v4, 0.0 }
  0xe7   :  { %v334_v10 = vmax.f32 %v280_v7, 0.0  ;;  %v503_v11 = vpop.f32.mrb[8].mxu0  ;;  %556 = vmatpush3.bf16.msra.mxu1 %v555_v6 }
  0xe8   :  { %v295_v13 = vadd.f32 %v503_v11, %v102_v61  ;;  %v289_v14 = vpop.f32.mrb[9].mxu0  ;;  %557 = vmatprep.subr.bf16.mxu1 %v604_v35 }
  0xe9   :  { %v558_v15 = vpack.c.bf16 %v335_v8, %v334_v10  ;;  %v290_v16 = vadd.f32 %v289_v14, %v97_v0 }
  0xea   :  { %v337_v17 = vmax.f32 %v295_v13, 0.0 }
  0xeb   :  { %v336_v18 = vmax.f32 %v290_v16, 0.0  ;;  %v506_v19 = vpop.f32.mrb[10].mxu0  ;;  %559 = vmatpush3.bf16.msra.mxu1 %v558_v15 }
  0xec   :  { %v305_v20 = vadd.f32 %v506_v19, %v112_v9  ;;  %v299_v21 = vpop.f32.mrb[11].mxu0  ;;  %560 = vmatprep.subr.bf16.mxu1 %v604_v35 }
  0xed   :  { %v561_v23 = vpack.c.bf16 %v337_v17, %v336_v18  ;;  %v300_v24 = vadd.f32 %v299_v21, %v107_v12 }
  0xee   :  { %v339_v26 = vmax.f32 %v305_v20, 0.0 }
  0xef   :  { %v338_v27 = vmax.f32 %v300_v24, 0.0  ;;  %v509_v28 = vpop.f32.mrb[12].mxu0  ;;  %562 = vmatpush3.bf16.msra.mxu1 %v561_v23 }
  0xf0   :  { %v315_v29 = vadd.f32 %v509_v28, %v122_v22  ;;  %v309_v30 = vpop.f32.mrb[13].mxu0  ;;  %563 = vmatprep.subr.bf16.mxu1 %v604_v35 }
  0xf1   :  { %v564_v31 = vpack.c.bf16 %v339_v26, %v338_v27  ;;  %v310_v32 = vadd.f32 %v309_v30, %v117_v25 }
  0xf2   :  { %v341_v33 = vmax.f32 %v315_v29, 0.0 }
  0xf3   :  { %v340_v36 = vmax.f32 %v310_v32, 0.0  ;;  %v512_v37 = vpop.f32.mrb[14].mxu0  ;;  %565 = vmatpush3.bf16.msra.mxu1 %v564_v31 }
  0xf4   :  { %v325_v39 = vadd.f32 %v512_v37, %v132_v34  ;;  %v319_v40 = vpop.f32.mrb[15].mxu0  ;;  %566 = vmatprep.subr.bf16.mxu1 %v604_v35 }
  0xf5   :  { %v567_v41 = vpack.c.bf16 %v341_v33, %v340_v36  ;;  %v320_v42 = vadd.f32 %v319_v40, %v127_v38 }
  0xf6   :  { %v343_v43 = vmax.f32 %v325_v39, 0.0 }
  0xf7   :  { %v342_v44 = vmax.f32 %v320_v42, 0.0  ;;  %568 = vmatpush3.bf16.msra.mxu1 %v567_v41 }
  0xf8   :  { %569 = vmatprep.subr.bf16.mxu1 %v604_v35 }
  0xf9   :  { %v570_v45 = vpack.c.bf16 %v343_v43, %v342_v44 }
  0xfb   :  { %571 = vmatpush3.bf16.msra.mxu1 %v570_v45 }
  0xfe   :  { %546 = vmatmul.mubr.f32.vlgmr.msra.gmra.mrb[0].mxu1 %v344_v46 }
 0x1d1   :  { %v417_v48 = vpop.f32.mrb[0].mxu1 }
 0x1d2   :  { %v418_v49 = vadd.f32 %v417_v48, %v349_v47  ;;  %v547_v50 = vpop.f32.mrb[1].mxu1 }
 0x1d4   :  { %422 = vst.msk [vmem:[#allocation2] sm:$0x3] %vm421_vm2, %v418_v49 }
 0x1d5   :  { %590 = shalt.err (!%p587_p4)
}
 0x1d6   :  { %s591_s3 = scalar_lea.hbm %s784_s5, 32 }
 0x1d7   :  { %p592_p5 = scmp.ne.s32.totalorder %s784_s5, %s591_s3  ;;  %p595_p6 = scmp.lt.u32.totalorder %s591_s3, %s784_s5 }
 0x1d9   :  { %p597_p7 = pnand %p595_p6, %p592_p5 }
 0x1db   :  { %600 = shalt.err (!%p597_p7)
}
 0x1dc   :  { %432 = dma.vmem_to_hbm [thread:$0]  %s430_s8, 32, %s784_s5, [#allocation3]  }
 0x1dd   :  { %601 = dma.done.wait [#allocation3], 32  }
 0x1de   :  { %602 = vsyncadd [#allocation3], 4294967264 }
 0x1df   :  { %436 = vsyncpa [#allocation3], 1 }

</bundles_post_ra>
